<compile_context>
chip_gen: v7x
topology: tpu7x:2x2x1
jax: 0.10.0
libtpu: 0.0.40
codegen_flags: <defaults>
</compile_context>

<pallas_src>
import functools

import jax
import jax.numpy as jnp
import numpy as np
from jax.experimental import pallas as pl
from jax.experimental.pallas import tpu as pltpu

_NEG = -1e30  # finite "minus infinity": avoids inf-inf NaNs in the online LSE


def _ntxent_kernel(row_ref, col_ref, loss_ref, m_sc, l_sc, pos_sc, *,
                   batch_size, tile_r, tile_c, inv_temp, use_cosine, eps):
    i = pl.program_id(0)          # row-tile index (parallel)
    j = pl.program_id(1)          # col-tile index (reduction axis, last)

    @pl.when(j == 0)
    def _init():
        m_sc[...] = jnp.full_like(m_sc, _NEG)
        l_sc[...] = jnp.zeros_like(l_sc)
        pos_sc[...] = jnp.zeros_like(pos_sc)

    rows = row_ref[...].astype(jnp.float32)     # (TR, D)
    cols = col_ref[...].astype(jnp.float32)     # (TC, D)

    # (TR, TC) similarity tile on the MXU.
    sim = jnp.einsum('rd,cd->rc', rows, cols,
                     preferred_element_type=jnp.float32)
    if use_cosine:
        # torch.nn.CosineSimilarity: dot / clamp(|x|*|y|, min=eps).
        # sqrt(max(s_r*s_c, eps^2)) == max(|x|*|y|, eps), so a single fused
        # rsqrt on the squared norms is exact and runs on the EUP slot.
        s_r = jnp.sum(rows * rows, axis=-1, keepdims=True)      # (TR, 1)
        s_c = jnp.sum(cols * cols, axis=-1, keepdims=True)      # (TC, 1)
        sim = sim * jax.lax.rsqrt(jnp.maximum(s_r * s_c.T, eps * eps))

    logits = sim * inv_temp

    # Global row / column indices of this tile.
    ri = i * tile_r + jax.lax.broadcasted_iota(jnp.int32, (tile_r, tile_c), 0)
    cj = j * tile_c + jax.lax.broadcasted_iota(jnp.int32, (tile_r, tile_c), 1)

    # Positive pairs sit on the +-batch_size diagonals: partner(r) = r +- B.
    partner = jnp.where(ri < batch_size, ri + batch_size, ri - batch_size)
    pos_sc[...] += jnp.sum(jnp.where(cj == partner, logits, 0.0),
                           axis=-1, keepdims=True)

    # Exclude self-similarity (main diagonal) from the log-sum-exp.  The +-B
    # diagonals stay in: {positive} U {negatives} == all j != i, exactly the
    # softmax denominator of the reference cross-entropy.
    masked = jnp.where(ri == cj, _NEG, logits)

    m_prev = m_sc[...]
    m_new = jnp.maximum(m_prev, jnp.max(masked, axis=-1, keepdims=True))
    l_sc[...] = (l_sc[...] * jnp.exp(m_prev - m_new)
                 + jnp.sum(jnp.exp(masked - m_new), axis=-1, keepdims=True))
    m_sc[...] = m_new

    @pl.when(j == pl.num_programs(1) - 1)
    def _finalize():
        lse = m_sc[...] + jnp.log(l_sc[...])
        loss_ref[...] = (lse - pos_sc[...]).astype(loss_ref.dtype)


def _pick_tile(n, d, itemsize, budget_bytes=4 * 1024 * 1024):
    """Largest tile that divides n, is a multiple of 8, and whose (t, d)
    input buffer stays within a per-buffer VMEM budget (v7x-safe)."""
    for t in (512, 256, 128, 64, 32, 16, 8):
        if n % t == 0 and t * d * itemsize <= budget_bytes:
            return t
    return n   # tiny n: full extent (allowed by the (8,128) rule)


def ntxent_loss(zis, zjs, *, temperature, use_cosine_similarity=True,
                block_rows=None, block_cols=None):
    """Pallas TPU equivalent of
    NTXentLoss(batch_size, temperature, use_cosine_similarity)(zis, zjs)."""
    assert zis.shape == zjs.shape and zis.ndim == 2
    batch_size, d = zis.shape
    n = 2 * batch_size
    reps = jnp.concatenate([zjs, zis], axis=0)          # (2B, D), torch order
    itemsize = jnp.dtype(reps.dtype).itemsize

    tr = block_rows if block_rows is not None else _pick_tile(n, d, itemsize)
    tc = block_cols if block_cols is not None else _pick_tile(n, d, itemsize)
    assert n % tr == 0 and n % tc == 0, (n, tr, tc)
    grid = (n // tr, n // tc)

    kernel = functools.partial(
        _ntxent_kernel,
        batch_size=batch_size, tile_r=tr, tile_c=tc,
        inv_temp=float(1.0 / temperature),
        use_cosine=bool(use_cosine_similarity), eps=1e-8)

    # 2 inputs x 2 pipeline buffers x (tile, D) + headroom for scratch/output.
    vmem_limit = int(2 * 2 * (tr + tc) * d * itemsize) + (4 << 20)
    vmem_limit = min(max(vmem_limit, 16 << 20), 100 << 20)

    cost = pl.CostEstimate(
        flops=2 * n * n * d + 10 * n * n,
        transcendentals=n * n + 2 * n,
        bytes_accessed=int((grid[0] + 1) * n * d * itemsize + n * 4))

    per_row = pl.pallas_call(
        kernel,
        out_shape=jax.ShapeDtypeStruct((n, 1), jnp.float32),
        grid_spec=pltpu.PrefetchScalarGridSpec(
            num_scalar_prefetch=0,
            grid=grid,
            in_specs=[
                pl.BlockSpec((tr, d), lambda i, j: (i, 0)),   # row tile
                pl.BlockSpec((tc, d), lambda i, j: (j, 0)),   # col tile
            ],
            out_specs=pl.BlockSpec((tr, 1), lambda i, j: (i, 0)),
            scratch_shapes=[
                pltpu.VMEM((tr, 1), jnp.float32),   # running max  m
                pltpu.VMEM((tr, 1), jnp.float32),   # running sum  l
                pltpu.VMEM((tr, 1), jnp.float32),   # positive logit
            ]),
        compiler_params=pltpu.CompilerParams(
            dimension_semantics=("parallel", "arbitrary"),
            vmem_limit_bytes=vmem_limit),
        cost_estimate=cost,
    )(reps, reps)

    # Cross-entropy with reduction='sum', divided by 2B.
    return jnp.sum(per_row) / n


def _reference_ntxent(zis, zjs, *, temperature, use_cosine_similarity):
    """Pure-JAX mirror of the PyTorch NTXentLoss.forward."""
    batch_size = zis.shape[0]
    n = 2 * batch_size
    reps = jnp.concatenate([zjs, zis], axis=0).astype(jnp.float32)
    dots = reps @ reps.T
    if use_cosine_similarity:
        norms = jnp.sqrt(jnp.sum(reps * reps, axis=-1))
        sim = dots / jnp.maximum(norms[:, None] * norms[None, :], 1e-8)
    else:
        sim = dots
    l_pos = jnp.diagonal(sim, offset=batch_size)
    r_pos = jnp.diagonal(sim, offset=-batch_size)
    positives = jnp.concatenate([l_pos, r_pos]).reshape(n, 1)
    mask = (1 - (np.eye(n) + np.eye(n, k=-batch_size)
                 + np.eye(n, k=batch_size))).astype(bool)
    negatives = jnp.stack(
        [sim[r, np.nonzero(mask[r])[0]] for r in range(n)])     # (n, n-2)
    logits = jnp.concatenate([positives, negatives], axis=1) / temperature
    # CrossEntropyLoss(reduction='sum') with all-zero labels.
    m = jnp.max(logits, axis=1, keepdims=True)
    lse = m[:, 0] + jnp.log(jnp.sum(jnp.exp(logits - m), axis=1))
    return jnp.sum(lse - logits[:, 0]) / n


if __name__ == "__main__":
    key = jax.random.PRNGKey(0)
    k1, k2, k3, k4 = jax.random.split(key, 4)

    # Small shapes consistent with the module: batch=2, hidden=32.
    B, D = 2, 32
    zis = jax.random.normal(k1, (B, D), dtype=jnp.float32)
    zjs = jax.random.normal(k2, (B, D), dtype=jnp.float32)

    # Cosine-similarity variant (single-tile path).
    got = ntxent_loss(zis, zjs, temperature=0.5, use_cosine_similarity=True)
    jax.block_until_ready(got)
    ref = _reference_ntxent(zis, zjs, temperature=0.5,
                            use_cosine_similarity=True)
    assert jnp.allclose(got, ref, atol=1e-4, rtol=1e-4), (got, ref)

    # Dot-product-similarity variant.
    got = ntxent_loss(zis, zjs, temperature=0.5, use_cosine_similarity=False)
    jax.block_until_ready(got)
    ref = _reference_ntxent(zis, zjs, temperature=0.5,
                            use_cosine_similarity=False)
    assert jnp.allclose(got, ref, atol=1e-4, rtol=1e-4), (got, ref)

    # Slightly larger batch with forced 8x8 tiles to exercise the streaming
    # multi-tile (online log-sum-exp + per-row-tile output) path.
    B2 = 8
    zis2 = jax.random.normal(k3, (B2, D), dtype=jnp.float32)
    zjs2 = jax.random.normal(k4, (B2, D), dtype=jnp.float32)
    got = ntxent_loss(zis2, zjs2, temperature=0.1, use_cosine_similarity=True,
                      block_rows=8, block_cols=8)
    jax.block_until_ready(got)
    ref = _reference_ntxent(zis2, zjs2, temperature=0.1,
                            use_cosine_similarity=True)
    assert jnp.allclose(got, ref, atol=1e-4, rtol=1e-4), (got, ref)

    # TODO(synk): the module's debug print() calls are intentionally omitted.
    print("KERNEL_OK")
</pallas_src>

<mosaic_0001>
module attributes {stable_mosaic.version = 11 : i64} {
  func.func @_ntxent_kernel(%arg0: i32, %arg1: i32, %arg2: memref<4x32xf32, #tpu.memory_space<vmem>>, %arg3: memref<4x32xf32, #tpu.memory_space<vmem>>, %arg4: memref<4x1xf32, #tpu.memory_space<vmem>>, %arg5: memref<4x1xf32, #tpu.memory_space<vmem>>, %arg6: memref<4x1xf32, #tpu.memory_space<vmem>>, %arg7: memref<4x1xf32, #tpu.memory_space<vmem>>) attributes {dimension_semantics = [#tpu.dimension_semantics<parallel>, #tpu.dimension_semantics<arbitrary>], iteration_bounds = array<i64: 1, 1>, scalar_prefetch = 0 : i64, scratch_operands = 3 : i64, tpu.core_type = #tpu.core_type<tc>, window_params = [{transform_indices = @transform_0, window_bounds = array<i64: 4, 32>}, {transform_indices = @transform_1, window_bounds = array<i64: 4, 32>}, {transform_indices = @transform_2, window_bounds = array<i64: 4, 1>}]} {
    %c0_i32 = arith.constant 0 : i32
    %0 = arith.cmpi eq, %arg1, %c0_i32 : i32
    %1 = arith.extui %0 : i1 to i32
    %c0_i32_0 = arith.constant 0 : i32
    %2 = arith.cmpi ne, %1, %c0_i32_0 : i32
    scf.if %2 {
      %cst_30 = arith.constant -1.000000e+30 : f32
      %67 = vector.broadcast %cst_30 : f32 to vector<4x1xf32>
      %c0_31 = arith.constant 0 : index
      %c0_32 = arith.constant 0 : index
      %68 = vector.load %arg5[%c0_31, %c0_32] : memref<4x1xf32, #tpu.memory_space<vmem>>, vector<4x1xf32>
      tpu.vector_store %arg5[%c0_31, %c0_32], %67 {strides = array<i32>} : memref<4x1xf32, #tpu.memory_space<vmem>>, vector<4x1xf32>,
      %cst_33 = arith.constant 0.000000e+00 : f32
      %69 = vector.broadcast %cst_33 : f32 to vector<4x1xf32>
      %c0_34 = arith.constant 0 : index
      %c0_35 = arith.constant 0 : index
      %70 = vector.load %arg6[%c0_34, %c0_35] : memref<4x1xf32, #tpu.memory_space<vmem>>, vector<4x1xf32>
      tpu.vector_store %arg6[%c0_34, %c0_35], %69 {strides = array<i32>} : memref<4x1xf32, #tpu.memory_space<vmem>>, vector<4x1xf32>,
      %cst_36 = arith.constant 0.000000e+00 : f32
      %71 = vector.broadcast %cst_36 : f32 to vector<4x1xf32>
      %c0_37 = arith.constant 0 : index
      %c0_38 = arith.constant 0 : index
      %72 = vector.load %arg7[%c0_37, %c0_38] : memref<4x1xf32, #tpu.memory_space<vmem>>, vector<4x1xf32>
      tpu.vector_store %arg7[%c0_37, %c0_38], %71 {strides = array<i32>} : memref<4x1xf32, #tpu.memory_space<vmem>>, vector<4x1xf32>,
    } else {
    }
    %c0 = arith.constant 0 : index
    %c0_1 = arith.constant 0 : index
    %3 = vector.load %arg2[%c0, %c0_1] : memref<4x32xf32, #tpu.memory_space<vmem>>, vector<4x32xf32>
    %c0_2 = arith.constant 0 : index
    %c0_3 = arith.constant 0 : index
    %4 = vector.load %arg3[%c0_2, %c0_3] : memref<4x32xf32, #tpu.memory_space<vmem>>, vector<4x32xf32>
    "tpu.trace_start"() <{level = 10 : i32, message = "rd,cd->rc"}> : () -> ()
    %cst = arith.constant dense<0.000000e+00> : vector<4x4xf32>
    %5 = tpu.matmul %3, %4, %cst {dimension_numbers = #tpu.dot_dimension_numbers<[1], [1], [0], [0], [0, 0, 1, 0], [], []>} : vector<4x32xf32>, vector<4x32xf32>, vector<4x4xf32> -> vector<4x4xf32>
    "tpu.trace_stop"() : () -> ()
    %6 = arith.mulf %3, %3 : vector<4x32xf32>
    %cst_4 = arith.constant dense<0.000000e+00> : vector<4xf32>
    %7 = vector.multi_reduction <add>, %6, %cst_4 [1] : vector<4x32xf32> to vector<4xf32>
    %8 = vector.shape_cast %7 : vector<4xf32> to vector<4x1xf32>
    %9 = arith.mulf %4, %4 : vector<4x32xf32>
    %cst_5 = arith.constant dense<0.000000e+00> : vector<4xf32>
    %10 = vector.multi_reduction <add>, %9, %cst_5 [1] : vector<4x32xf32> to vector<4xf32>
    %11 = vector.shape_cast %10 : vector<4xf32> to vector<4x1xf32>
    %12 = tpu.transpose %11, [1, 0] : vector<4x1xf32> -> vector<1x4xf32>
    %13 = vector.broadcast %8 : vector<4x1xf32> to vector<4x4xf32>
    %14 = vector.broadcast %12 : vector<1x4xf32> to vector<4x4xf32>
    %15 = arith.mulf %13, %14 : vector<4x4xf32>
    %cst_6 = arith.constant 1.000000e-16 : f32
    %16 = vector.broadcast %cst_6 : f32 to vector<4x4xf32>
    %17 = arith.maximumf %15, %16 : vector<4x4xf32>
    %18 = math.rsqrt %17 : vector<4x4xf32>
    %19 = arith.mulf %5, %18 : vector<4x4xf32>
    %cst_7 = arith.constant 2.000000e+00 : f32
    %20 = vector.broadcast %cst_7 : f32 to vector<4x4xf32>
    %21 = arith.mulf %19, %20 : vector<4x4xf32>
    %c4_i32 = arith.constant 4 : i32
    %22 = arith.muli %arg0, %c4_i32 : i32
    %23 = tpu.iota {dimensions = array<i32: 0>} : vector<4x4xi32>
    %24 = vector.broadcast %22 : i32 to vector<4x4xi32>
    %25 = arith.addi %24, %23 : vector<4x4xi32>
    %c4_i32_8 = arith.constant 4 : i32
    %26 = arith.muli %arg1, %c4_i32_8 : i32
    %27 = tpu.iota {dimensions = array<i32: 1>} : vector<4x4xi32>
    %28 = vector.broadcast %26 : i32 to vector<4x4xi32>
    %29 = arith.addi %28, %27 : vector<4x4xi32>
    %c2_i32 = arith.constant 2 : i32
    %30 = vector.broadcast %c2_i32 : i32 to vector<4x4xi32>
    %31 = arith.cmpi slt, %25, %30 : vector<4x4xi32>
    %c2_i32_9 = arith.constant 2 : i32
    %32 = vector.broadcast %c2_i32_9 : i32 to vector<4x4xi32>
    %33 = arith.addi %25, %32 : vector<4x4xi32>
    %c2_i32_10 = arith.constant 2 : i32
    %34 = vector.broadcast %c2_i32_10 : i32 to vector<4x4xi32>
    %35 = arith.subi %25, %34 : vector<4x4xi32>
    %36 = arith.select %31, %33, %35 : vector<4x4xi1>, vector<4x4xi32>
    %c0_11 = arith.constant 0 : index
    %c0_12 = arith.constant 0 : index
    %37 = vector.load %arg7[%c0_11, %c0_12] : memref<4x1xf32, #tpu.memory_space<vmem>>, vector<4x1xf32>
    %38 = arith.cmpi eq, %29, %36 : vector<4x4xi32>
    %cst_13 = arith.constant 0.000000e+00 : f32
    %39 = vector.broadcast %cst_13 : f32 to vector<4x4xf32>
    %40 = arith.select %38, %21, %39 : vector<4x4xi1>, vector<4x4xf32>
    %cst_14 = arith.constant dense<0.000000e+00> : vector<4xf32>
    %41 = vector.multi_reduction <add>, %40, %cst_14 [1] : vector<4x4xf32> to vector<4xf32>
    %42 = vector.shape_cast %41 : vector<4xf32> to vector<4x1xf32>
    %43 = arith.addf %37, %42 : vector<4x1xf32>
    %c0_15 = arith.constant 0 : index
    %c0_16 = arith.constant 0 : index
    %44 = vector.load %arg7[%c0_15, %c0_16] : memref<4x1xf32, #tpu.memory_space<vmem>>, vector<4x1xf32>
    tpu.vector_store %arg7[%c0_15, %c0_16], %43 {strides = array<i32>} : memref<4x1xf32, #tpu.memory_space<vmem>>, vector<4x1xf32>,
    %45 = arith.cmpi eq, %25, %29 : vector<4x4xi32>
    %cst_17 = arith.constant -1.000000e+30 : f32
    %46 = vector.broadcast %cst_17 : f32 to vector<4x4xf32>
    %47 = arith.select %45, %46, %21 : vector<4x4xi1>, vector<4x4xf32>
    %c0_18 = arith.constant 0 : index
    %c0_19 = arith.constant 0 : index
    %48 = vector.load %arg5[%c0_18, %c0_19] : memref<4x1xf32, #tpu.memory_space<vmem>>, vector<4x1xf32>
    %cst_20 = arith.constant dense<0xFF800000> : vector<4xf32>
    %49 = vector.multi_reduction <maximumf>, %47, %cst_20 [1] : vector<4x4xf32> to vector<4xf32>
    %50 = vector.shape_cast %49 : vector<4xf32> to vector<4x1xf32>
    %51 = arith.maximumf %48, %50 : vector<4x1xf32>
    %c0_21 = arith.constant 0 : index
    %c0_22 = arith.constant 0 : index
    %52 = vector.load %arg6[%c0_21, %c0_22] : memref<4x1xf32, #tpu.memory_space<vmem>>, vector<4x1xf32>
    %53 = arith.subf %48, %51 : vector<4x1xf32>
    %54 = math.exp %53 : vector<4x1xf32>
    %55 = arith.mulf %52, %54 : vector<4x1xf32>
    %56 = vector.broadcast %51 : vector<4x1xf32> to vector<4x4xf32>
    %57 = arith.subf %47, %56 : vector<4x4xf32>
    %58 = math.exp %57 : vector<4x4xf32>
    %cst_23 = arith.constant dense<0.000000e+00> : vector<4xf32>
    %59 = vector.multi_reduction <add>, %58, %cst_23 [1] : vector<4x4xf32> to vector<4xf32>
    %60 = vector.shape_cast %59 : vector<4xf32> to vector<4x1xf32>
    %61 = arith.addf %55, %60 : vector<4x1xf32>
    %c0_24 = arith.constant 0 : index
    %c0_25 = arith.constant 0 : index
    %62 = vector.load %arg6[%c0_24, %c0_25] : memref<4x1xf32, #tpu.memory_space<vmem>>, vector<4x1xf32>
    tpu.vector_store %arg6[%c0_24, %c0_25], %61 {strides = array<i32>} : memref<4x1xf32, #tpu.memory_space<vmem>>, vector<4x1xf32>,
    %c0_26 = arith.constant 0 : index
    %c0_27 = arith.constant 0 : index
    %63 = vector.load %arg5[%c0_26, %c0_27] : memref<4x1xf32, #tpu.memory_space<vmem>>, vector<4x1xf32>
    tpu.vector_store %arg5[%c0_26, %c0_27], %51 {strides = array<i32>} : memref<4x1xf32, #tpu.memory_space<vmem>>, vector<4x1xf32>,
    %c0_i32_28 = arith.constant 0 : i32
    %64 = arith.cmpi eq, %arg1, %c0_i32_28 : i32
    %65 = arith.extui %64 : i1 to i32
    %c0_i32_29 = arith.constant 0 : i32
    %66 = arith.cmpi ne, %65, %c0_i32_29 : i32
    scf.if %66 {
      %c0_30 = arith.constant 0 : index
      %c0_31 = arith.constant 0 : index
      %67 = vector.load %arg5[%c0_30, %c0_31] : memref<4x1xf32, #tpu.memory_space<vmem>>, vector<4x1xf32>
      %c0_32 = arith.constant 0 : index
      %c0_33 = arith.constant 0 : index
      %68 = vector.load %arg6[%c0_32, %c0_33] : memref<4x1xf32, #tpu.memory_space<vmem>>, vector<4x1xf32>
      %69 = math.log %68 : vector<4x1xf32>
      %70 = arith.addf %67, %69 : vector<4x1xf32>
      %c0_34 = arith.constant 0 : index
      %c0_35 = arith.constant 0 : index
      %71 = vector.load %arg7[%c0_34, %c0_35] : memref<4x1xf32, #tpu.memory_space<vmem>>, vector<4x1xf32>
      %72 = arith.subf %70, %71 : vector<4x1xf32>
      %c0_36 = arith.constant 0 : index
      %c0_37 = arith.constant 0 : index
      %73 = vector.load %arg4[%c0_36, %c0_37] : memref<4x1xf32, #tpu.memory_space<vmem>>, vector<4x1xf32>
      tpu.vector_store %arg4[%c0_36, %c0_37], %72 {strides = array<i32>} : memref<4x1xf32, #tpu.memory_space<vmem>>, vector<4x1xf32>,
    } else {
    }
    return
  }
  func.func @transform_0(%arg0: i32, %arg1: i32) -> (i32, i32) {
    %c0_i32 = arith.constant 0 : i32
    %c0_i32_0 = arith.constant 0 : i32
    return %arg0, %c0_i32 : i32, i32
  }
  func.func @transform_1(%arg0: i32, %arg1: i32) -> (i32, i32) {
    %c0_i32 = arith.constant 0 : i32
    %c0_i32_0 = arith.constant 0 : i32
    return %arg1, %c0_i32 : i32, i32
  }
  func.func @transform_2(%arg0: i32, %arg1: i32) -> (i32, i32) {
    %c0_i32 = arith.constant 0 : i32
    %c0_i32_0 = arith.constant 0 : i32
    return %arg0, %c0_i32 : i32, i32
  }
}

</mosaic_0001>

<bundles_post_ra>
// kernel: tpu_custom_call.1
= control target key start
LH: loop header
LB: loop body
LE: loop exit
PB: predicated region body
PF: predicated region fallthrough
CT: control target
= control target key end

     0   :  { %7 = vsyncpa [#allocation6], 0  ;;  %s370_s0 = inlined_call_operand.hbm [shape: f32[4,32], index: 0, kind: input, shape index: {}]   ;;  %s371_s1 = inlined_call_operand.hbm [shape: f32[4,32], index: 1, kind: input, shape index: {}]   ;;  %s372_s2 = inlined_call_operand.vmem [shape: f32[4,1], index: 2, kind: output, shape index: {}]  }
   0x1   :  { %8 = vsyncpa [#allocation8], 0  ;;  %s312_s9 = smov [#allocation5]   ;;  %s313_s11 = smov [#allocation7]  }
   0x2   :  { %s15_s10 = sshll.u32 %s312_s9, 4  ;;  %s25_s12 = sshll.u32 %s313_s11, 4  ;;  %s16_s10 = int_to_ptr.vmem [resolvable:$true] %s15_s10  ;;  %s26_s12 = int_to_ptr.vmem [resolvable:$true] %s25_s12 }
   0x3   :  { %s264_s15 = scalar_lea.hbm %s370_s0, 64 }
   0x4   :  { %p265_p0 = scmp.ne.s32.totalorder %s370_s0, %s264_s15  ;;  %p268_p1 = scmp.lt.u32.totalorder %s264_s15, %s370_s0 }
   0x6   :  { %p270_p2 = pnand %p268_p1, %p265_p0 }
   0x8   :  { %273 = shalt.err (!%p270_p2)
}
   0x9   :  { %s274_s20 = scalar_lea.vmem %s16_s10, 64  ;;  %p279_p4 = scmp.lt.s32.totalorder %s16_s10, %s16_s10 }
   0xa   :  { %p275_p3 = scmp.ne.s32.totalorder %s16_s10, %s274_s20  ;;  %p280_p5 = scmp.lt.s32.totalorder %s274_s20, %s274_s20 }
   0xc   :  { %p281_p6 = por %p280_p5, %p279_p4 }
   0xe   :  { %p282_p7 = pnand %p281_p6, %p275_p3 }
  0x10   :  { %285 = shalt.err (!%p282_p7)
}
  0x11   :  { %18 = dma.hbm_to_vmem [thread:$0]  %s370_s0, 64, %s16_s10, [#allocation6]  }
  0x12   :  { %s286_s25 = scalar_lea.hbm %s371_s1, 64 }
  0x13   :  { %p287_p8 = scmp.ne.s32.totalorder %s371_s1, %s286_s25  ;;  %p290_p9 = scmp.lt.u32.totalorder %s286_s25, %s371_s1 }
  0x15   :  { %p292_p10 = pnand %p290_p9, %p287_p8 }
  0x17   :  { %295 = shalt.err (!%p292_p10)
}
  0x18   :  { %s296_s30 = scalar_lea.vmem %s26_s12, 64  ;;  %p301_p12 = scmp.lt.s32.totalorder %s26_s12, %s26_s12 }
  0x19   :  { %p297_p11 = scmp.ne.s32.totalorder %s26_s12, %s296_s30  ;;  %p302_p13 = scmp.lt.s32.totalorder %s296_s30, %s296_s30 }
  0x1b   :  { %p303_p0 = por %p302_p13, %p301_p12 }
  0x1d   :  { %p304_p1 = pnand %p303_p0, %p297_p11 }
  0x1f   :  { %307 = shalt.err (!%p304_p1)
}
  0x20   :  { %28 = dma.hbm_to_vmem [thread:$0]  %s371_s1, 64, %s26_s12, [#allocation8]  }
  0x21   :  { %308 = dma.done.wait [#allocation6], 64  }
  0x22   :  { %309 = vsyncadd [#allocation6], 4294967232 }
  0x23   :  { %310 = dma.done.wait [#allocation8], 64  }
  0x24   :  { %311 = vsyncadd [#allocation8], 4294967232  ;;  %vm39_vm0 = vcmask 3072   ;;  %v314_v0 = vmov 0.0   ;;  %vm315_vm1 = vmmov 0   ;;  %vm45_vm2 = vcmask 261120  }
  0x25   :  { %41 = vst.msk [vmem:[#allocation3] sm:$0xf] %vm39_vm0, %v314_v0  ;;  %42 = vst.msk [vmem:[#allocation4] sm:$0xf] %vm39_vm0, %v314_v0  ;;  %244 = vmatprep.subr.mxu0 %v314_v0  ;;  %246 = vmatprep.mubr.msk.f32.mxu0 %vm315_vm1, %v314_v0  ;;  %v44_v1 = vld [vmem:[#allocation7] sm:$0xf]  ;;  %v163_v11 = vlaneseq }
  0x26   :  { %vm123_vm3 = vcmask 257024   ;;  %v43_v2 = vld [vmem:[#allocation5] sm:$0xf]  ;;  %v127_v3 = vmul.f32 %v44_v1, %v44_v1  ;;  %245 = vmatpush3.xpose.msk.msra.mxu0 %vm45_vm2, %v44_v1  ;;  %v316_v8 = vmov -1e+30   ;;  %vm189_vm7 = vcmask 27648  }
  0x27   :  { %v122_v4 = vmul.f32 %v43_v2, %v43_v2  ;;  %40 = vst.msk [vmem:[#allocation2] sm:$0xf] %vm39_vm0, %v316_v8  ;;  %v164_v12 = vshrl.u32 %v163_v11, 7  ;;  %v179_v21 = vand.u32 127, %v163_v11  ;;  %v317_v29 = vmov 0  }
  0x28   :  { %v128_v5 = vsel %vm123_vm3, %v127_v3, 0.0  ;;  %255 = vset.pattern.permute.xlu0 %v317_v29 }
  0x29   :  { %129 = vadd.xlane.f32.xlu0 %v128_v5  ;;  %247 = vmatmul.mubr.msk.f32.vlgmr.msra.gmra.mrb[0].mxu0 %vm45_vm2, %v43_v2  ;;  %v124_v6 = vsel %vm123_vm3, %v122_v4, 0.0  ;;  %v165_v13 = vsub.s32 0, %v164_v12  ;;  %v183_v19 = vadd.s32 2, %v164_v12  ;;  %v241_v20 = vadd.s32 4294967294, %v164_v12 }
  0x2a   :  { %vm182_vm4 = vcmp.lt.s32.totalorder %v164_v12, 2  ;;  %vm196_vm5 = vcmp.eq.s32.totalorder %v164_v12, %v179_v21 }
  0x2b   :  { %v185_v22 = vsel %vm182_vm4, %v183_v19, %v241_v20 }
  0x2c   :  { %vm187_vm6 = vcmp.eq.s32.totalorder %v179_v21, %v185_v22  ;;  %v203_v42 = vld [vmem:[#allocation3] sm:$0xf]  ;;  %v186_v46 = vld [vmem:[#allocation4] sm:$0xf] }
  0x2d   :  { %125 = vadd.xlane.f32.xlu0 %v124_v6 }
  0x2e   :  { %v198_v30 = vld [vmem:[#allocation2] sm:$0xf] }
  0xb6   :  { %v130_v7 = vpop.xlane.xlu0 %129 }
  0xb7   :  { %131 = vxpose.xlu1.b32.start.end [1/1] (short) (narrow) %v130_v7, 8 }
  0xba   :  { %v126_v15 = vpop.xlane.xlu0 %125 }
  0xfc   :  { %v118_v9 = vpop.f32.mrb[0].mxu0 }
  0xfd   :  { %v248_v10 = vpop.f32.mrb[1].mxu0 }
 0x137   :  { %v147_v14 = vpop.trf.xlu1 }
 0x138   :  { %v166_v16 = vrot.slane %v147_v14, %v165_v13 }
 0x13a   :  { %v167_v17 = vmul.f32 %v166_v16, %v126_v15 }
 0x13c   :  { %v168_v18 = vmax.f32 %v167_v17, 1e-16 }
 0x13e   :  { %256 = vrsqrt.f32 %v168_v18 }
 0x148   :  { %v257_v23 = vpop.eup %256 }
 0x149   :  { %v170_v24 = vmul.f32 %v257_v23, %v118_v9 }
 0x14b   :  { %v171_v25 = vmul.f32 2.0, %v170_v24 }
 0x14d   :  { %v197_v26 = vsel %vm196_vm5, -1e+30, %v171_v25  ;;  %v188_v27 = vsel %vm187_vm6, %v171_v25, 0.0 }
 0x14e   :  { %v199_v28 = vsel %vm189_vm7, %v197_v26, -inf  ;;  %v190_v39 = vsel %vm189_vm7, %v188_v27, 0.0 }
 0x14f   :  { %200 = vmax.xlane.f32.xlu1 %v199_v28 }
 0x1dc   :  { %v201_v31 = vpop.xlane.xlu1 %200 }
 0x1dd   :  { %v202_v32 = vmax.f32 %v198_v30, %v201_v31 }
 0x1df   :  { %v204_v33 = vsub.f32 %v198_v30, %v202_v32  ;;  %221 = vst.msk [vmem:[#allocation2] sm:$0xf] %vm39_vm0, %v202_v32  ;;  %210 = vperm.xlu0 %255, %v202_v32  }
 0x1e1   :  { %v205_v40 = vmul.f32 1.442695, %v204_v33 }
 0x1e6   :  { %v225_v52 = vld [vmem:[#allocation2] sm:$0xf] }
 0x25e   :  { %v211_v34 = vpop.permute.xlu0 %210 }
 0x25f   :  { %v213_v35 = vsub.f32 %v197_v26, %v211_v34 }
 0x261   :  { %v214_v36 = vmul.f32 1.442695, %v213_v35 }
 0x263   :  { %258 = vpow2.f32 %v214_v36 }
 0x264   :  { %260 = vpow2.f32 %v205_v40 }
 0x26d   :  { %v259_v37 = vpop.eup %258 }
 0x26e   :  { %v216_v38 = vsel %vm189_vm7, %v259_v37, 0.0  ;;  %v261_v41 = vpop.eup %260 }
 0x26f   :  { %217 = vadd.xlane.f32.xlu1 %v216_v38  ;;  %v207_v43 = vmul.f32 %v261_v41, %v203_v42 }
 0x273   :  { %191 = vadd.xlane.f32.xlu1 %v190_v39 }
 0x2fc   :  { %v218_v44 = vpop.xlane.xlu1 %217 }
 0x2fd   :  { %v219_v45 = vadd.f32 %v218_v44, %v207_v43 }
 0x2ff   :  { %220 = vst.msk [vmem:[#allocation3] sm:$0xf] %vm39_vm0, %v219_v45 }
 0x300   :  { %v192_v47 = vpop.xlane.xlu1 %191 }
 0x301   :  { %v193_v48 = vadd.f32 %v192_v47, %v186_v46 }
 0x303   :  { %195 = vst.msk [vmem:[#allocation4] sm:$0xf] %vm39_vm0, %v193_v48 }
 0x306   :  { %v226_v49 = vld [vmem:[#allocation3] sm:$0xf] }
 0x307   :  { %262 = vlog2.f32 %v226_v49 }
 0x30a   :  { %v230_v54 = vld [vmem:[#allocation4] sm:$0xf] }
 0x311   :  { %v263_v50 = vpop.eup %262 }
 0x312   :  { %v228_v51 = vmul.f32 0.6931472, %v263_v50 }
 0x314   :  { %v229_v53 = vadd.f32 %v228_v51, %v225_v52 }
 0x316   :  { %v231_v55 = vsub.f32 %v229_v53, %v230_v54 }
 0x318   :  { %232 = vst.msk [vmem:[%s372_s2] sm:$0xf] %vm39_vm0, %v231_v55 }
 0x319   :  { %237 = vsyncpa [#allocation6], 1 }
 0x31a   :  { %238 = vsyncpa [#allocation8], 1 }

</bundles_post_ra>
